<compile_context>
chip_gen: v7x
topology: tpu7x:2x2x1
jax: 0.10.0
libtpu: 0.0.40
codegen_flags: <defaults>
</compile_context>

<pallas_src>
import jax
import jax.numpy as jnp
from jax import lax
from jax.experimental import pallas as pl
from jax.experimental.pallas import tpu as pltpu


NBUF = 8  # number of in-flight row-gather DMAs (power of 2)


def vd_embedding_kernel(tok_smem, mtile_ref, w_hbm, out_ref, gbuf, sem):
    """Gather one token tile from the HBM weight table and apply the row mask.

    tok_smem : SMEM (N_pad,) int32       -- scalar-prefetched token ids (full array)
    mtile_ref: VMEM (tn, 1) f32          -- per-token dropout-mask values for this tile
    w_hbm    : HBM  (V, D_pad) f32       -- raw embedding table (not tiled)
    out_ref  : VMEM (tn, D_pad) f32      -- output tile
    gbuf     : VMEM (tn, D_pad) f32      -- gather landing buffer (scratch)
    sem      : DMA semaphores (NBUF,)
    """
    tn = out_ref.shape[0]
    base = pl.program_id(0) * tn

    def start_row(r):
        tok = tok_smem[base + r]
        pltpu.make_async_copy(
            w_hbm.at[pl.ds(tok, 1), :],
            gbuf.at[pl.ds(r, 1), :],
            sem.at[r % NBUF],
        ).start()

    def wait_row(r):
        # src index is irrelevant for wait(); only shapes / semaphore must match.
        pltpu.make_async_copy(
            w_hbm.at[pl.ds(0, 1), :],
            gbuf.at[pl.ds(r, 1), :],
            sem.at[r % NBUF],
        ).wait()

    # Prime up to NBUF row fetches (static trip count).
    for r in range(min(NBUF, tn)):
        start_row(r)

    # Drain row r, immediately refill with row r + NBUF.
    def body(r, carry):
        wait_row(r)

        @pl.when(r + NBUF < tn)
        def _():
            start_row(r + NBUF)

        return carry

    lax.fori_loop(0, tn, body, 0)

    # Variational dropout on vocab rows == scale each gathered row by mask[token].
    # (tn, 1) broadcasts over the lane dimension; single lane-dense store.
    out_ref[...] = gbuf[...] * mtile_ref[...]


def vd_embedding(tokens, mask, weight, *, tile_n=256):
    """tokens: int array (any shape); mask: (V,) or (V,1) f32; weight: (V, D) f32.

    Returns tokens.shape + (D,) f32, equal to (mask * weight)[tokens].
    """
    orig_shape = tokens.shape
    tok_flat = tokens.reshape(-1).astype(jnp.int32)
    N = tok_flat.shape[0]
    V, D = weight.shape

    # Clamp ids so a bad id cannot trigger an OOB HBM DMA (PyTorch would raise instead).
    tok_flat = jnp.clip(tok_flat, 0, V - 1)

    # Lane-dense output: pad embedding dim up to a multiple of 128.
    D_pad = max(128, ((D + 127) // 128) * 128)
    if D_pad != D:
        weight = jnp.pad(weight, ((0, 0), (0, D_pad - D)))

    # Token tile: multiple of 8 sublanes, capped at tile_n (sweepable).
    # NOTE(v7x): for best megacore use, pick tile_n so N_pad // tn is even.
    tn = min(tile_n, max(8, ((N + 7) // 8) * 8))
    tn = max(8, (tn // 8) * 8)
    N_pad = ((N + tn - 1) // tn) * tn
    if N_pad != N:
        tok_flat = jnp.pad(tok_flat, (0, N_pad - N))  # pad with token 0 (in range)

    # Per-token mask values (tiny O(N) gather in the wrapper; the scale itself is in-kernel).
    mask_tok = mask.reshape(-1)[tok_flat].reshape(N_pad, 1).astype(jnp.float32)

    out = pl.pallas_call(
        vd_embedding_kernel,
        out_shape=jax.ShapeDtypeStruct((N_pad, D_pad), jnp.float32),
        grid_spec=pltpu.PrefetchScalarGridSpec(
            num_scalar_prefetch=1,                       # token ids -> SMEM
            grid=(N_pad // tn,),
            in_specs=[
                pl.BlockSpec((tn, 1), lambda i, tok: (i, 0)),   # per-token mask tile
                pl.BlockSpec(memory_space=pl.ANY),              # weight table stays in HBM
            ],
            out_specs=pl.BlockSpec((tn, D_pad), lambda i, tok: (i, 0)),
            scratch_shapes=[
                pltpu.VMEM((tn, D_pad), jnp.float32),           # gather landing buffer
                pltpu.SemaphoreType.DMA((NBUF,)),
            ],
        ),
        compiler_params=pltpu.CompilerParams(
            dimension_semantics=("parallel",)),
    )(tok_flat, mask_tok, weight)

    return out[:N, :D].reshape(*orig_shape, D)


if __name__ == "__main__":
    # Module hyperparameters (small, consistent with __init__ signature).
    vocab_size = 64
    embedding_dim = 32
    dropout_p = 0.25
    padding_idx = 0   # only affects grads / init in PyTorch; forward is a plain lookup
    batch, seq = 2, 8

    key = jax.random.PRNGKey(0)
    k_w, k_mask, k_tok = jax.random.split(key, 3)

    # init_weights(): uniform_(-0.1, 0.1) over the whole table (padding row included).
    raw_weight = jax.random.uniform(
        k_w, (vocab_size, embedding_dim), dtype=jnp.float32, minval=-0.1, maxval=0.1)

    # Variational dropout mask over vocab rows (training mode): Bernoulli(1-p) / (1-p).
    # At eval time the wrapper should be given an all-ones mask (handled outside the kernel).
    keep = jax.random.bernoulli(k_mask, p=1.0 - dropout_p, shape=(vocab_size, 1))
    mask = keep.astype(jnp.float32) / (1.0 - dropout_p)

    # Input token ids x: (batch, seq).
    x = jax.random.randint(k_tok, (batch, seq), 0, vocab_size, dtype=jnp.int32)

    out = vd_embedding(x, mask, raw_weight)
    jax.block_until_ready(out)

    # Pure-JAX reference: (mask * W)[x]
    ref = (mask * raw_weight)[x]
    assert out.shape == (batch, seq, embedding_dim)
    assert jnp.allclose(out, ref, atol=1e-6), "mismatch vs reference"

    print("KERNEL_OK")
</pallas_src>

<mosaic_0001>
module attributes {stable_mosaic.version = 11 : i64} {
  func.func @vd_embedding_kernel(%arg0: i32, %arg1: memref<16xi32, #tpu.memory_space<smem>>, %arg2: memref<16x1xf32, #tpu.memory_space<vmem>>, %arg3: memref<64x128xf32, #tpu.memory_space<any>>, %arg4: memref<16x128xf32, #tpu.memory_space<vmem>>, %arg5: memref<16x128xf32, #tpu.memory_space<vmem>>, %arg6: memref<8x!tpu.dma_semaphore, #tpu.memory_space<semaphore_mem>>) attributes {dimension_semantics = [#tpu.dimension_semantics<parallel>], iteration_bounds = array<i64: 1>, scalar_prefetch = 1 : i64, scratch_operands = 2 : i64, tpu.core_type = #tpu.core_type<tc>, window_params = [{transform_indices = @transform_0, window_bounds = array<i64: 16, 1>}, {}, {transform_indices = @transform_2, window_bounds = array<i64: 16, 128>}]} {
    %c16_i32 = arith.constant 16 : i32
    %0 = arith.muli %arg0, %c16_i32 : i32
    %c0_i32 = arith.constant 0 : i32
    %1 = arith.addi %0, %c0_i32 : i32
    %2 = arith.index_cast %1 : i32 to index
    %3 = memref.load %arg1[%2] : memref<16xi32, #tpu.memory_space<smem>>
    %c0_i32_0 = arith.constant 0 : i32
    %c0_i32_1 = arith.constant 0 : i32
    %4 = tpu.memref_slice %arg3[%3, %c0_i32_1] : memref<64x128xf32, #tpu.memory_space<any>> -> memref<1x128xf32, #tpu.memory_space<any>>
    %c0_i32_2 = arith.constant 0 : i32
    %c0_i32_3 = arith.constant 0 : i32
    %5 = tpu.memref_slice %arg5[%c0_i32_2, %c0_i32_3] : memref<16x128xf32, #tpu.memory_space<vmem>> -> memref<1x128xf32, #tpu.memory_space<vmem>>
    %6 = tpu.memref_slice %arg6[%c0_i32_0] : memref<8x!tpu.dma_semaphore, #tpu.memory_space<semaphore_mem>> -> memref<1x!tpu.dma_semaphore, #tpu.memory_space<semaphore_mem>>
    %7 = tpu.memref_squeeze %6 : memref<1x!tpu.dma_semaphore, #tpu.memory_space<semaphore_mem>> -> memref<!tpu.dma_semaphore, #tpu.memory_space<semaphore_mem>>
    tpu.enqueue_dma source(%4 : memref<1x128xf32, #tpu.memory_space<any>>) target(%5 : memref<1x128xf32, #tpu.memory_space<vmem>>) target_semaphore(%7 : memref<!tpu.dma_semaphore, #tpu.memory_space<semaphore_mem>>)
    %c1_i32 = arith.constant 1 : i32
    %8 = arith.addi %0, %c1_i32 : i32
    %9 = arith.index_cast %8 : i32 to index
    %10 = memref.load %arg1[%9] : memref<16xi32, #tpu.memory_space<smem>>
    %c1_i32_4 = arith.constant 1 : i32
    %c0_i32_5 = arith.constant 0 : i32
    %11 = tpu.memref_slice %arg3[%10, %c0_i32_5] : memref<64x128xf32, #tpu.memory_space<any>> -> memref<1x128xf32, #tpu.memory_space<any>>
    %c1_i32_6 = arith.constant 1 : i32
    %c0_i32_7 = arith.constant 0 : i32
    %12 = tpu.memref_slice %arg5[%c1_i32_6, %c0_i32_7] : memref<16x128xf32, #tpu.memory_space<vmem>> -> memref<1x128xf32, #tpu.memory_space<vmem>>
    %13 = tpu.memref_slice %arg6[%c1_i32_4] : memref<8x!tpu.dma_semaphore, #tpu.memory_space<semaphore_mem>> -> memref<1x!tpu.dma_semaphore, #tpu.memory_space<semaphore_mem>>
    %14 = tpu.memref_squeeze %13 : memref<1x!tpu.dma_semaphore, #tpu.memory_space<semaphore_mem>> -> memref<!tpu.dma_semaphore, #tpu.memory_space<semaphore_mem>>
    tpu.enqueue_dma source(%11 : memref<1x128xf32, #tpu.memory_space<any>>) target(%12 : memref<1x128xf32, #tpu.memory_space<vmem>>) target_semaphore(%14 : memref<!tpu.dma_semaphore, #tpu.memory_space<semaphore_mem>>)
    %c2_i32 = arith.constant 2 : i32
    %15 = arith.addi %0, %c2_i32 : i32
    %16 = arith.index_cast %15 : i32 to index
    %17 = memref.load %arg1[%16] : memref<16xi32, #tpu.memory_space<smem>>
    %c2_i32_8 = arith.constant 2 : i32
    %c0_i32_9 = arith.constant 0 : i32
    %18 = tpu.memref_slice %arg3[%17, %c0_i32_9] : memref<64x128xf32, #tpu.memory_space<any>> -> memref<1x128xf32, #tpu.memory_space<any>>
    %c2_i32_10 = arith.constant 2 : i32
    %c0_i32_11 = arith.constant 0 : i32
    %19 = tpu.memref_slice %arg5[%c2_i32_10, %c0_i32_11] : memref<16x128xf32, #tpu.memory_space<vmem>> -> memref<1x128xf32, #tpu.memory_space<vmem>>
    %20 = tpu.memref_slice %arg6[%c2_i32_8] : memref<8x!tpu.dma_semaphore, #tpu.memory_space<semaphore_mem>> -> memref<1x!tpu.dma_semaphore, #tpu.memory_space<semaphore_mem>>
    %21 = tpu.memref_squeeze %20 : memref<1x!tpu.dma_semaphore, #tpu.memory_space<semaphore_mem>> -> memref<!tpu.dma_semaphore, #tpu.memory_space<semaphore_mem>>
    tpu.enqueue_dma source(%18 : memref<1x128xf32, #tpu.memory_space<any>>) target(%19 : memref<1x128xf32, #tpu.memory_space<vmem>>) target_semaphore(%21 : memref<!tpu.dma_semaphore, #tpu.memory_space<semaphore_mem>>)
    %c3_i32 = arith.constant 3 : i32
    %22 = arith.addi %0, %c3_i32 : i32
    %23 = arith.index_cast %22 : i32 to index
    %24 = memref.load %arg1[%23] : memref<16xi32, #tpu.memory_space<smem>>
    %c3_i32_12 = arith.constant 3 : i32
    %c0_i32_13 = arith.constant 0 : i32
    %25 = tpu.memref_slice %arg3[%24, %c0_i32_13] : memref<64x128xf32, #tpu.memory_space<any>> -> memref<1x128xf32, #tpu.memory_space<any>>
    %c3_i32_14 = arith.constant 3 : i32
    %c0_i32_15 = arith.constant 0 : i32
    %26 = tpu.memref_slice %arg5[%c3_i32_14, %c0_i32_15] : memref<16x128xf32, #tpu.memory_space<vmem>> -> memref<1x128xf32, #tpu.memory_space<vmem>>
    %27 = tpu.memref_slice %arg6[%c3_i32_12] : memref<8x!tpu.dma_semaphore, #tpu.memory_space<semaphore_mem>> -> memref<1x!tpu.dma_semaphore, #tpu.memory_space<semaphore_mem>>
    %28 = tpu.memref_squeeze %27 : memref<1x!tpu.dma_semaphore, #tpu.memory_space<semaphore_mem>> -> memref<!tpu.dma_semaphore, #tpu.memory_space<semaphore_mem>>
    tpu.enqueue_dma source(%25 : memref<1x128xf32, #tpu.memory_space<any>>) target(%26 : memref<1x128xf32, #tpu.memory_space<vmem>>) target_semaphore(%28 : memref<!tpu.dma_semaphore, #tpu.memory_space<semaphore_mem>>)
    %c4_i32 = arith.constant 4 : i32
    %29 = arith.addi %0, %c4_i32 : i32
    %30 = arith.index_cast %29 : i32 to index
    %31 = memref.load %arg1[%30] : memref<16xi32, #tpu.memory_space<smem>>
    %c4_i32_16 = arith.constant 4 : i32
    %c0_i32_17 = arith.constant 0 : i32
    %32 = tpu.memref_slice %arg3[%31, %c0_i32_17] : memref<64x128xf32, #tpu.memory_space<any>> -> memref<1x128xf32, #tpu.memory_space<any>>
    %c4_i32_18 = arith.constant 4 : i32
    %c0_i32_19 = arith.constant 0 : i32
    %33 = tpu.memref_slice %arg5[%c4_i32_18, %c0_i32_19] : memref<16x128xf32, #tpu.memory_space<vmem>> -> memref<1x128xf32, #tpu.memory_space<vmem>>
    %34 = tpu.memref_slice %arg6[%c4_i32_16] : memref<8x!tpu.dma_semaphore, #tpu.memory_space<semaphore_mem>> -> memref<1x!tpu.dma_semaphore, #tpu.memory_space<semaphore_mem>>
    %35 = tpu.memref_squeeze %34 : memref<1x!tpu.dma_semaphore, #tpu.memory_space<semaphore_mem>> -> memref<!tpu.dma_semaphore, #tpu.memory_space<semaphore_mem>>
    tpu.enqueue_dma source(%32 : memref<1x128xf32, #tpu.memory_space<any>>) target(%33 : memref<1x128xf32, #tpu.memory_space<vmem>>) target_semaphore(%35 : memref<!tpu.dma_semaphore, #tpu.memory_space<semaphore_mem>>)
    %c5_i32 = arith.constant 5 : i32
    %36 = arith.addi %0, %c5_i32 : i32
    %37 = arith.index_cast %36 : i32 to index
    %38 = memref.load %arg1[%37] : memref<16xi32, #tpu.memory_space<smem>>
    %c5_i32_20 = arith.constant 5 : i32
    %c0_i32_21 = arith.constant 0 : i32
    %39 = tpu.memref_slice %arg3[%38, %c0_i32_21] : memref<64x128xf32, #tpu.memory_space<any>> -> memref<1x128xf32, #tpu.memory_space<any>>
    %c5_i32_22 = arith.constant 5 : i32
    %c0_i32_23 = arith.constant 0 : i32
    %40 = tpu.memref_slice %arg5[%c5_i32_22, %c0_i32_23] : memref<16x128xf32, #tpu.memory_space<vmem>> -> memref<1x128xf32, #tpu.memory_space<vmem>>
    %41 = tpu.memref_slice %arg6[%c5_i32_20] : memref<8x!tpu.dma_semaphore, #tpu.memory_space<semaphore_mem>> -> memref<1x!tpu.dma_semaphore, #tpu.memory_space<semaphore_mem>>
    %42 = tpu.memref_squeeze %41 : memref<1x!tpu.dma_semaphore, #tpu.memory_space<semaphore_mem>> -> memref<!tpu.dma_semaphore, #tpu.memory_space<semaphore_mem>>
    tpu.enqueue_dma source(%39 : memref<1x128xf32, #tpu.memory_space<any>>) target(%40 : memref<1x128xf32, #tpu.memory_space<vmem>>) target_semaphore(%42 : memref<!tpu.dma_semaphore, #tpu.memory_space<semaphore_mem>>)
    %c6_i32 = arith.constant 6 : i32
    %43 = arith.addi %0, %c6_i32 : i32
    %44 = arith.index_cast %43 : i32 to index
    %45 = memref.load %arg1[%44] : memref<16xi32, #tpu.memory_space<smem>>
    %c6_i32_24 = arith.constant 6 : i32
    %c0_i32_25 = arith.constant 0 : i32
    %46 = tpu.memref_slice %arg3[%45, %c0_i32_25] : memref<64x128xf32, #tpu.memory_space<any>> -> memref<1x128xf32, #tpu.memory_space<any>>
    %c6_i32_26 = arith.constant 6 : i32
    %c0_i32_27 = arith.constant 0 : i32
    %47 = tpu.memref_slice %arg5[%c6_i32_26, %c0_i32_27] : memref<16x128xf32, #tpu.memory_space<vmem>> -> memref<1x128xf32, #tpu.memory_space<vmem>>
    %48 = tpu.memref_slice %arg6[%c6_i32_24] : memref<8x!tpu.dma_semaphore, #tpu.memory_space<semaphore_mem>> -> memref<1x!tpu.dma_semaphore, #tpu.memory_space<semaphore_mem>>
    %49 = tpu.memref_squeeze %48 : memref<1x!tpu.dma_semaphore, #tpu.memory_space<semaphore_mem>> -> memref<!tpu.dma_semaphore, #tpu.memory_space<semaphore_mem>>
    tpu.enqueue_dma source(%46 : memref<1x128xf32, #tpu.memory_space<any>>) target(%47 : memref<1x128xf32, #tpu.memory_space<vmem>>) target_semaphore(%49 : memref<!tpu.dma_semaphore, #tpu.memory_space<semaphore_mem>>)
    %c7_i32 = arith.constant 7 : i32
    %50 = arith.addi %0, %c7_i32 : i32
    %51 = arith.index_cast %50 : i32 to index
    %52 = memref.load %arg1[%51] : memref<16xi32, #tpu.memory_space<smem>>
    %c7_i32_28 = arith.constant 7 : i32
    %c0_i32_29 = arith.constant 0 : i32
    %53 = tpu.memref_slice %arg3[%52, %c0_i32_29] : memref<64x128xf32, #tpu.memory_space<any>> -> memref<1x128xf32, #tpu.memory_space<any>>
    %c7_i32_30 = arith.constant 7 : i32
    %c0_i32_31 = arith.constant 0 : i32
    %54 = tpu.memref_slice %arg5[%c7_i32_30, %c0_i32_31] : memref<16x128xf32, #tpu.memory_space<vmem>> -> memref<1x128xf32, #tpu.memory_space<vmem>>
    %55 = tpu.memref_slice %arg6[%c7_i32_28] : memref<8x!tpu.dma_semaphore, #tpu.memory_space<semaphore_mem>> -> memref<1x!tpu.dma_semaphore, #tpu.memory_space<semaphore_mem>>
    %56 = tpu.memref_squeeze %55 : memref<1x!tpu.dma_semaphore, #tpu.memory_space<semaphore_mem>> -> memref<!tpu.dma_semaphore, #tpu.memory_space<semaphore_mem>>
    tpu.enqueue_dma source(%53 : memref<1x128xf32, #tpu.memory_space<any>>) target(%54 : memref<1x128xf32, #tpu.memory_space<vmem>>) target_semaphore(%56 : memref<!tpu.dma_semaphore, #tpu.memory_space<semaphore_mem>>)
    %c0_i32_32 = arith.constant 0 : i32
    %c16_i32_33 = arith.constant 16 : i32
    %57 = arith.addi %c0_i32_32, %c16_i32_33 : i32
    %c1_i32_34 = arith.constant 1 : i32
    scf.for %arg7 = %c0_i32_32 to %57 step %c1_i32_34  : i32 {
      %c8_i32 = arith.constant 8 : i32
      %c0_i32_41 = arith.constant 0 : i32
      %63 = arith.cmpi eq, %c8_i32, %c0_i32_41 : i32
      %c1_i32_42 = arith.constant 1 : i32
      %64 = arith.select %63, %c1_i32_42, %c8_i32 : i32
      %65 = arith.remsi %arg7, %64 : i32
      %c0_i32_43 = arith.constant 0 : i32
      %66 = arith.cmpi ne, %65, %c0_i32_43 : i32
      %c0_i32_44 = arith.constant 0 : i32
      %67 = arith.cmpi slt, %65, %c0_i32_44 : i32
      %c0_i32_45 = arith.constant 0 : i32
      %68 = arith.cmpi slt, %64, %c0_i32_45 : i32
      %69 = arith.xori %67, %68 : i1
      %70 = arith.andi %69, %66 : i1
      %71 = arith.addi %65, %64 : i32
      %72 = arith.select %70, %71, %65 : i32
      %c0_i32_46 = arith.constant 0 : i32
      %c0_i32_47 = arith.constant 0 : i32
      %73 = tpu.memref_slice %arg3[%c0_i32_46, %c0_i32_47] : memref<64x128xf32, #tpu.memory_space<any>> -> memref<1x128xf32, #tpu.memory_space<any>>
      %c0_i32_48 = arith.constant 0 : i32
      %74 = tpu.memref_slice %arg5[%arg7, %c0_i32_48] : memref<16x128xf32, #tpu.memory_space<vmem>> -> memref<1x128xf32, #tpu.memory_space<vmem>>
      %75 = tpu.memref_slice %arg6[%72] : memref<8x!tpu.dma_semaphore, #tpu.memory_space<semaphore_mem>> -> memref<1x!tpu.dma_semaphore, #tpu.memory_space<semaphore_mem>>
      %76 = tpu.memref_squeeze %75 : memref<1x!tpu.dma_semaphore, #tpu.memory_space<semaphore_mem>> -> memref<!tpu.dma_semaphore, #tpu.memory_space<semaphore_mem>>
      tpu.wait_dma2 semaphore(%76 : memref<!tpu.dma_semaphore, #tpu.memory_space<semaphore_mem>>) src(%73 : memref<1x128xf32, #tpu.memory_space<any>>) dst(%74 : memref<1x128xf32, #tpu.memory_space<vmem>>)
      %c8_i32_49 = arith.constant 8 : i32
      %77 = arith.addi %arg7, %c8_i32_49 : i32
      %c16_i32_50 = arith.constant 16 : i32
      %78 = arith.cmpi slt, %77, %c16_i32_50 : i32
      %79 = arith.extui %78 : i1 to i32
      %c0_i32_51 = arith.constant 0 : i32
      %80 = arith.cmpi ne, %79, %c0_i32_51 : i32
      scf.if %80 {
        %c8_i32_52 = arith.constant 8 : i32
        %81 = arith.addi %arg7, %c8_i32_52 : i32
        %82 = arith.addi %0, %81 : i32
        %83 = arith.index_cast %82 : i32 to index
        %84 = memref.load %arg1[%83] : memref<16xi32, #tpu.memory_space<smem>>
        %c8_i32_53 = arith.constant 8 : i32
        %c0_i32_54 = arith.constant 0 : i32
        %85 = arith.cmpi eq, %c8_i32_53, %c0_i32_54 : i32
        %c1_i32_55 = arith.constant 1 : i32
        %86 = arith.select %85, %c1_i32_55, %c8_i32_53 : i32
        %87 = arith.remsi %81, %86 : i32
        %c0_i32_56 = arith.constant 0 : i32
        %88 = arith.cmpi ne, %87, %c0_i32_56 : i32
        %c0_i32_57 = arith.constant 0 : i32
        %89 = arith.cmpi slt, %87, %c0_i32_57 : i32
        %c0_i32_58 = arith.constant 0 : i32
        %90 = arith.cmpi slt, %86, %c0_i32_58 : i32
        %91 = arith.xori %89, %90 : i1
        %92 = arith.andi %91, %88 : i1
        %93 = arith.addi %87, %86 : i32
        %94 = arith.select %92, %93, %87 : i32
        %c0_i32_59 = arith.constant 0 : i32
        %95 = tpu.memref_slice %arg3[%84, %c0_i32_59] : memref<64x128xf32, #tpu.memory_space<any>> -> memref<1x128xf32, #tpu.memory_space<any>>
        %c0_i32_60 = arith.constant 0 : i32
        %96 = tpu.memref_slice %arg5[%81, %c0_i32_60] : memref<16x128xf32, #tpu.memory_space<vmem>> -> memref<1x128xf32, #tpu.memory_space<vmem>>
        %97 = tpu.memref_slice %arg6[%94] : memref<8x!tpu.dma_semaphore, #tpu.memory_space<semaphore_mem>> -> memref<1x!tpu.dma_semaphore, #tpu.memory_space<semaphore_mem>>
        %98 = tpu.memref_squeeze %97 : memref<1x!tpu.dma_semaphore, #tpu.memory_space<semaphore_mem>> -> memref<!tpu.dma_semaphore, #tpu.memory_space<semaphore_mem>>
        tpu.enqueue_dma source(%95 : memref<1x128xf32, #tpu.memory_space<any>>) target(%96 : memref<1x128xf32, #tpu.memory_space<vmem>>) target_semaphore(%98 : memref<!tpu.dma_semaphore, #tpu.memory_space<semaphore_mem>>)
      } else {
      }
    }
    %c16_i32_35 = arith.constant 16 : i32
    %c0 = arith.constant 0 : index
    %c0_36 = arith.constant 0 : index
    %58 = vector.load %arg5[%c0, %c0_36] : memref<16x128xf32, #tpu.memory_space<vmem>>, vector<16x128xf32>
    %c0_37 = arith.constant 0 : index
    %c0_38 = arith.constant 0 : index
    %59 = vector.load %arg2[%c0_37, %c0_38] : memref<16x1xf32, #tpu.memory_space<vmem>>, vector<16x1xf32>
    %60 = vector.broadcast %59 : vector<16x1xf32> to vector<16x128xf32>
    %61 = arith.mulf %58, %60 : vector<16x128xf32>
    %c0_39 = arith.constant 0 : index
    %c0_40 = arith.constant 0 : index
    %62 = vector.load %arg4[%c0_39, %c0_40] : memref<16x128xf32, #tpu.memory_space<vmem>>, vector<16x128xf32>
    tpu.vector_store %arg4[%c0_39, %c0_40], %61 {strides = array<i32>} : memref<16x128xf32, #tpu.memory_space<vmem>>, vector<16x128xf32>,
    return
  }
  func.func @transform_0(%arg0: i32, %arg1: memref<16xi32, #tpu.memory_space<smem>>) -> (i32, i32) {
    %c0_i32 = arith.constant 0 : i32
    %c0_i32_0 = arith.constant 0 : i32
    return %arg0, %c0_i32 : i32, i32
  }
  func.func @transform_2(%arg0: i32, %arg1: memref<16xi32, #tpu.memory_space<smem>>) -> (i32, i32) {
    %c0_i32 = arith.constant 0 : i32
    %c0_i32_0 = arith.constant 0 : i32
    return %arg0, %c0_i32 : i32, i32
  }
}

</mosaic_0001>

<bundles_post_ra>
// kernel: tpu_custom_call.1
= control target key start
LH: loop header
LB: loop body
LE: loop exit
PB: predicated region body
PF: predicated region fallthrough
CT: control target
= control target key end

     0   :  { %s870_s0 = inlined_call_operand.vmem [shape: s32[16], index: 0, kind: input, shape index: {}]   ;;  %s871_s1 = inlined_call_operand.vmem [shape: f32[16,1], index: 1, kind: input, shape index: {}]   ;;  %s872_s2 = inlined_call_operand.hbm [shape: f32[64,128], index: 2, kind: input, shape index: {}]   ;;  %s873_s3 = inlined_call_operand.hbm [shape: f32[16,128], index: 3, kind: output, shape index: {}]  }
   0x1   :  { %s8_s14 = sshll.u32 %s870_s0, 4  ;;  %s9_s14 = int_to_ptr.vmem [resolvable:$true] %s8_s14 }
   0x2   :  { %s381_s15 = scalar_lea.vmem %s9_s14, 16  ;;  %p386_p1 = scmp.lt.s32.totalorder %s9_s14, %s9_s14 }
   0x3   :  { %p382_p0 = scmp.ne.s32.totalorder %s9_s14, %s381_s15  ;;  %p387_p2 = scmp.lt.s32.totalorder %s381_s15, %s381_s15 }
   0x5   :  { %p388_p3 = por %p387_p2, %p386_p1 }
   0x7   :  { %p389_p4 = pnand %p388_p3, %p382_p0 }
   0x9   :  { %392 = shalt.err (!%p389_p4)  }
   0xa   :  { %s649_s16 = smov [#allocation5]  }
   0xb   :  { %11 = dma.vmem_to_smem %s9_s14, 16, %s649_s16, [#allocation4] }
   0xc   :  { %639 = dma.done.wait [#allocation4], 16 }
   0xd   :  { %640 = vsyncadd [#allocation4], 4294967280 }
   0xe   :  { %13 = sfence }
   0xf   :  { %14 = vsyncpa [#allocation7], 0  ;;  %s18_s17 = sld [smem:[#allocation5]]  ;;  %s650_s18 = smov [#allocation2]  }
  0x10   :  { %s28_s19 = sshll.u32 %s650_s18, 4  ;;  %s685_s20 = sld [smem:[#allocation5 + $0x1]]  ;;  %s687_s19 = int_to_ptr.vmem [resolvable:$true] %s28_s19 }
  0x11   :  { %s651_s0 = smov [#allocation2 + $0x1]   ;;  %s689_s22 = sld [smem:[#allocation5 + $0x2]] }
  0x12   :  { %s45_s21 = sshll.u32 %s651_s0, 4  ;;  %s652_s23 = smov [#allocation2 + $0x2]   ;;  %s691_s21 = int_to_ptr.vmem [resolvable:$true] %s45_s21 }
  0x13   :  { %s62_s24 = sshll.u32 %s652_s23, 4  ;;  %s693_s25 = sld [smem:[#allocation5 + $0x3]]  ;;  %s695_s24 = int_to_ptr.vmem [resolvable:$true] %s62_s24 }
  0x14   :  { %s704_s7 = scalar_lea.hbm %s872_s2, 1024 }
  0x15   :  { %s323_s26 = sshll.u32 %s18_s17, 4 }
  0x16   :  { %s20_s29 = scalar_lea.hbm %s872_s2, %s323_s26  ;;  %s325_s30 = sshll.u32 %s685_s20, 4 }
  0x17   :  { %s393_s4 = scalar_lea.hbm %s20_s29, 16  ;;  %p396_p6 = scmp.lt.u32.totalorder %s20_s29, %s872_s2 }
  0x18   :  { %p394_p5 = scmp.ne.s32.totalorder %s20_s29, %s393_s4  ;;  %p397_p7 = scmp.lt.u32.totalorder %s704_s7, %s393_s4 }
  0x19   :  { %p399_p9 = scmp.lt.u32.totalorder %s393_s4, %s20_s29 }
  0x1a   :  { %p398_p8 = por %p397_p7, %p396_p6 }
  0x1c   :  { %p400_p10 = por %p399_p9, %p398_p8 }
  0x1e   :  { %p401_p11 = pnand %p400_p10, %p394_p5 }
  0x20   :  { %404 = shalt.err (!%p401_p11)  }
  0x21   :  { %s405_s10 = scalar_lea.vmem %s687_s19, 16  ;;  %s713_s11 = scalar_lea.vmem %s687_s19, 256 }
  0x22   :  { %p406_p12 = scmp.ne.s32.totalorder %s687_s19, %s405_s10  ;;  %p410_p13 = scmp.lt.s32.totalorder %s687_s19, %s687_s19 }
  0x23   :  { %p411_p0 = scmp.lt.s32.totalorder %s713_s11, %s405_s10 }
  0x25   :  { %p412_p1 = por %p411_p0, %p410_p13 }
  0x27   :  { %p413_p2 = pnand %p412_p1, %p406_p12 }
  0x29   :  { %416 = shalt.err (!%p413_p2)  }
  0x2a   :  { %31 = dma.hbm_to_vmem [thread:$0]  %s20_s29, 16, %s687_s19, [#allocation3] }
  0x2b   :  { %s35_s14 = scalar_lea.hbm %s872_s2, %s325_s30  ;;  %s327_s15 = sshll.u32 %s689_s22, 4 }
  0x2c   :  { %s417_s16 = scalar_lea.hbm %s35_s14, 16  ;;  %p420_p4 = scmp.lt.u32.totalorder %s35_s14, %s872_s2 }
  0x2d   :  { %p418_p3 = scmp.ne.s32.totalorder %s35_s14, %s417_s16  ;;  %p421_p5 = scmp.lt.u32.totalorder %s704_s7, %s417_s16 }
  0x2e   :  { %p423_p7 = scmp.lt.u32.totalorder %s417_s16, %s35_s14 }
  0x2f   :  { %p422_p6 = por %p421_p5, %p420_p4 }
  0x31   :  { %p424_p8 = por %p423_p7, %p422_p6 }
  0x33   :  { %p425_p9 = pnand %p424_p8, %p418_p3 }
  0x35   :  { %428 = shalt.err (!%p425_p9)  }
  0x36   :  { %s429_s20 = scalar_lea.vmem %s691_s21, 16  ;;  %p434_p11 = scmp.lt.s32.totalorder %s691_s21, %s687_s19 }
  0x37   :  { %p430_p10 = scmp.ne.s32.totalorder %s691_s21, %s429_s20  ;;  %p435_p12 = scmp.lt.s32.totalorder %s713_s11, %s429_s20 }
  0x39   :  { %p436_p13 = por %p435_p12, %p434_p11 }
  0x3b   :  { %p437_p0 = pnand %p436_p13, %p430_p10 }
  0x3d   :  { %440 = shalt.err (!%p437_p0)  }
  0x3e   :  { %48 = dma.hbm_to_vmem [thread:$0]  %s35_s14, 16, %s691_s21, [#allocation3 + $0x1] }
  0x3f   :  { %s52_s23 = scalar_lea.hbm %s872_s2, %s327_s15  ;;  %s329_s26 = sshll.u32 %s693_s25, 4 }
  0x40   :  { %s441_s27 = scalar_lea.hbm %s52_s23, 16  ;;  %p444_p2 = scmp.lt.u32.totalorder %s52_s23, %s872_s2 }
  0x41   :  { %p442_p1 = scmp.ne.s32.totalorder %s52_s23, %s441_s27  ;;  %p445_p3 = scmp.lt.u32.totalorder %s704_s7, %s441_s27 }
  0x42   :  { %p447_p5 = scmp.lt.u32.totalorder %s441_s27, %s52_s23 }
  0x43   :  { %p446_p4 = por %p445_p3, %p444_p2 }
  0x45   :  { %p448_p6 = por %p447_p5, %p446_p4 }
  0x47   :  { %p449_p7 = pnand %p448_p6, %p442_p1 }
  0x49   :  { %452 = shalt.err (!%p449_p7)  }
  0x4a   :  { %s453_s21 = scalar_lea.vmem %s695_s24, 16  ;;  %p458_p9 = scmp.lt.s32.totalorder %s695_s24, %s687_s19 }
  0x4b   :  { %p454_p8 = scmp.ne.s32.totalorder %s695_s24, %s453_s21  ;;  %p459_p10 = scmp.lt.s32.totalorder %s713_s11, %s453_s21 }
  0x4d   :  { %p460_p11 = por %p459_p10, %p458_p9 }
  0x4f   :  { %p461_p12 = pnand %p460_p11, %p454_p8 }
  0x51   :  { %464 = shalt.err (!%p461_p12)  }
  0x52   :  { %65 = dma.hbm_to_vmem [thread:$0]  %s52_s23, 16, %s695_s24, [#allocation3 + $0x2] }
  0x53   :  { %s69_s4 = scalar_lea.hbm %s872_s2, %s329_s26  ;;  %s653_s5 = smov [#allocation2 + $0x3]  }
  0x54   :  { %s79_s6 = sshll.u32 %s653_s5, 4  ;;  %s750_s8 = sld [smem:[#allocation5 + $0x4]]  ;;  %s80_s6 = int_to_ptr.vmem [resolvable:$true] %s79_s6 }
  0x55   :  { %s465_s9 = scalar_lea.hbm %s69_s4, 16  ;;  %p468_p0 = scmp.lt.u32.totalorder %s69_s4, %s872_s2 }
  0x56   :  { %p466_p13 = scmp.ne.s32.totalorder %s69_s4, %s465_s9  ;;  %p469_p1 = scmp.lt.u32.totalorder %s704_s7, %s465_s9 }
  0x57   :  { %p471_p3 = scmp.lt.u32.totalorder %s465_s9, %s69_s4 }
  0x58   :  { %p470_p2 = por %p469_p1, %p468_p0 }
  0x5a   :  { %p472_p4 = por %p471_p3, %p470_p2 }
  0x5c   :  { %p473_p5 = pnand %p472_p4, %p466_p13 }
  0x5e   :  { %476 = shalt.err (!%p473_p5)  }
  0x5f   :  { %s477_s24 = scalar_lea.vmem %s80_s6, 16  ;;  %p482_p7 = scmp.lt.s32.totalorder %s80_s6, %s687_s19 }
  0x60   :  { %p478_p6 = scmp.ne.s32.totalorder %s80_s6, %s477_s24  ;;  %p483_p8 = scmp.lt.s32.totalorder %s713_s11, %s477_s24 }
  0x62   :  { %p484_p9 = por %p483_p8, %p482_p7 }
  0x64   :  { %p485_p10 = pnand %p484_p9, %p478_p6 }
  0x66   :  { %488 = shalt.err (!%p485_p10)  }
  0x67   :  { %82 = dma.hbm_to_vmem [thread:$0]  %s69_s4, 16, %s80_s6, [#allocation3 + $0x3] }
  0x68   :  { %s654_s13 = smov [#allocation2 + $0x4]   ;;  %s758_s15 = sld [smem:[#allocation5 + $0x5]] }
  0x69   :  { %s96_s14 = sshll.u32 %s654_s13, 4  ;;  %s655_s16 = smov [#allocation2 + $0x5]   ;;  %s97_s14 = int_to_ptr.vmem [resolvable:$true] %s96_s14 }
  0x6a   :  { %s113_s17 = sshll.u32 %s655_s16, 4  ;;  %s760_s18 = sld [smem:[#allocation5 + $0x6]]  ;;  %s763_s17 = int_to_ptr.vmem [resolvable:$true] %s113_s17 }
  0x6b   :  { %s331_s20 = sshll.u32 %s750_s8, 4 }
  0x6c   :  { %s86_s23 = scalar_lea.hbm %s872_s2, %s331_s20 }
  0x6d   :  { %s489_s26 = scalar_lea.hbm %s86_s23, 16  ;;  %p492_p12 = scmp.lt.u32.totalorder %s86_s23, %s872_s2 }
  0x6e   :  { %p490_p11 = scmp.ne.s32.totalorder %s86_s23, %s489_s26  ;;  %p493_p13 = scmp.lt.u32.totalorder %s704_s7, %s489_s26 }
  0x6f   :  { %p495_p1 = scmp.lt.u32.totalorder %s489_s26, %s86_s23 }
  0x70   :  { %p494_p0 = por %p493_p13, %p492_p12 }
  0x72   :  { %p496_p2 = por %p495_p1, %p494_p0 }
  0x74   :  { %p497_p3 = pnand %p496_p2, %p490_p11 }
  0x76   :  { %500 = shalt.err (!%p497_p3)  }
  0x77   :  { %s501_s29 = scalar_lea.vmem %s97_s14, 16  ;;  %p506_p5 = scmp.lt.s32.totalorder %s97_s14, %s687_s19 }
  0x78   :  { %p502_p4 = scmp.ne.s32.totalorder %s97_s14, %s501_s29  ;;  %p507_p6 = scmp.lt.s32.totalorder %s713_s11, %s501_s29 }
  0x7a   :  { %p508_p7 = por %p507_p6, %p506_p5 }
  0x7c   :  { %p509_p8 = pnand %p508_p7, %p502_p4 }
  0x7e   :  { %512 = shalt.err (!%p509_p8)  }
  0x7f   :  { %99 = dma.hbm_to_vmem [thread:$0]  %s86_s23, 16, %s97_s14, [#allocation3 + $0x4] }
  0x80   :  { %s333_s21 = sshll.u32 %s758_s15, 4  ;;  %s656_s25 = smov [#allocation2 + $0x6]  }
  0x81   :  { %s130_s30 = sshll.u32 %s656_s25, 4  ;;  %s103_s6 = scalar_lea.hbm %s872_s2, %s333_s21  ;;  %s778_s30 = int_to_ptr.vmem [resolvable:$true] %s130_s30 }
  0x82   :  { %s513_s8 = scalar_lea.hbm %s103_s6, 16  ;;  %p516_p10 = scmp.lt.u32.totalorder %s103_s6, %s872_s2 }
  0x83   :  { %p514_p9 = scmp.ne.s32.totalorder %s103_s6, %s513_s8  ;;  %p517_p11 = scmp.lt.u32.totalorder %s704_s7, %s513_s8 }
  0x84   :  { %p519_p13 = scmp.lt.u32.totalorder %s513_s8, %s103_s6 }
  0x85   :  { %p518_p12 = por %p517_p11, %p516_p10 }
  0x87   :  { %p520_p0 = por %p519_p13, %p518_p12 }
  0x89   :  { %p521_p1 = pnand %p520_p0, %p514_p9 }
  0x8b   :  { %524 = shalt.err (!%p521_p1)  }
  0x8c   :  { %s525_s12 = scalar_lea.vmem %s763_s17, 16  ;;  %p530_p3 = scmp.lt.s32.totalorder %s763_s17, %s687_s19 }
  0x8d   :  { %p526_p2 = scmp.ne.s32.totalorder %s763_s17, %s525_s12  ;;  %p531_p4 = scmp.lt.s32.totalorder %s713_s11, %s525_s12 }
  0x8f   :  { %p532_p5 = por %p531_p4, %p530_p3 }
  0x91   :  { %p533_p6 = pnand %p532_p5, %p526_p2 }
  0x93   :  { %536 = shalt.err (!%p533_p6)  }
  0x94   :  { %116 = dma.hbm_to_vmem [thread:$0]  %s103_s6, 16, %s763_s17, [#allocation3 + $0x5] }
  0x95   :  { %s335_s24 = sshll.u32 %s760_s18, 4  ;;  %s336_s13 = sld [smem:[#allocation5 + $0x7]] }
  0x96   :  { %s120_s16 = scalar_lea.hbm %s872_s2, %s335_s24 }
  0x97   :  { %s537_s20 = scalar_lea.hbm %s120_s16, 16  ;;  %p540_p8 = scmp.lt.u32.totalorder %s120_s16, %s872_s2 }
  0x98   :  { %p538_p7 = scmp.ne.s32.totalorder %s120_s16, %s537_s20  ;;  %p541_p9 = scmp.lt.u32.totalorder %s704_s7, %s537_s20 }
  0x99   :  { %p543_p11 = scmp.lt.u32.totalorder %s537_s20, %s120_s16 }
  0x9a   :  { %p542_p10 = por %p541_p9, %p540_p8 }
  0x9c   :  { %p544_p12 = por %p543_p11, %p542_p10 }
  0x9e   :  { %p545_p13 = pnand %p544_p12, %p538_p7 }
  0xa0   :  { %548 = shalt.err (!%p545_p13)  }
  0xa1   :  { %s549_s17 = scalar_lea.vmem %s778_s30, 16  ;;  %p554_p1 = scmp.lt.s32.totalorder %s778_s30, %s687_s19 }
  0xa2   :  { %p550_p0 = scmp.ne.s32.totalorder %s778_s30, %s549_s17  ;;  %p555_p2 = scmp.lt.s32.totalorder %s713_s11, %s549_s17 }
  0xa4   :  { %p556_p3 = por %p555_p2, %p554_p1 }
  0xa6   :  { %p557_p4 = pnand %p556_p3, %p550_p0 }
  0xa8   :  { %560 = shalt.err (!%p557_p4)  }
  0xa9   :  { %133 = dma.hbm_to_vmem [thread:$0]  %s120_s16, 16, %s778_s30, [#allocation3 + $0x6] }
  0xaa   :  { %s657_s18 = smov [#allocation2 + $0x7]   ;;  %s337_s26 = sshll.u32 %s336_s13, 4 }
  0xab   :  { %s147_s23 = sshll.u32 %s657_s18, 4  ;;  %s137_s29 = scalar_lea.hbm %s872_s2, %s337_s26  ;;  %s148_s23 = int_to_ptr.vmem [resolvable:$true] %s147_s23 }
  0xac   :  { %s561_s21 = scalar_lea.hbm %s137_s29, 16  ;;  %p564_p6 = scmp.lt.u32.totalorder %s137_s29, %s872_s2 }
  0xad   :  { %p562_p5 = scmp.ne.s32.totalorder %s137_s29, %s561_s21  ;;  %p565_p7 = scmp.lt.u32.totalorder %s704_s7, %s561_s21 }
  0xae   :  { %p567_p9 = scmp.lt.u32.totalorder %s561_s21, %s137_s29 }
  0xaf   :  { %p566_p8 = por %p565_p7, %p564_p6 }
  0xb1   :  { %p568_p10 = por %p567_p9, %p566_p8 }
  0xb3   :  { %p569_p11 = pnand %p568_p10, %p562_p5 }
  0xb5   :  { %572 = shalt.err (!%p569_p11)  }
  0xb6   :  { %s573_s30 = scalar_lea.vmem %s148_s23, 16  ;;  %p578_p13 = scmp.lt.s32.totalorder %s148_s23, %s687_s19 }
  0xb7   :  { %p574_p12 = scmp.ne.s32.totalorder %s148_s23, %s573_s30  ;;  %p579_p0 = scmp.lt.s32.totalorder %s713_s11, %s573_s30 }
  0xb9   :  { %p580_p1 = por %p579_p0, %p578_p13 }
  0xbb   :  { %p581_p2 = pnand %p580_p1, %p574_p12 }
  0xbd   :  { %584 = shalt.err (!%p581_p2)  }
  0xbe   :  { %150 = dma.hbm_to_vmem [thread:$0]  %s137_s29, 16, %s148_s23, [#allocation3 + $0x7] }
  0xbf   :  { %s813_s5 = smov 0  }
  0xc0 LB: > { %p157_p3 = scmp.lt.s32.totalorder %s647_s5, 0  ;;  %s158_s6 = ssub.s32 0, %s647_s5  ;;  %s647_s5 = sphi %s813_s5, %s156_s5  }
  0xc1   : > { %s338_s8 = smin.u32 %s647_s5, %s158_s6 }
  0xc2   : > { %s160_s9 = sand.u32 7, %s338_s8  }
  0xc3   : > { %s161_s10 = ssub.s32 0, %s160_s9 }
  0xc4   : > { %s875_s10 = smov (!%p157_p3, %s161_s10), %s160_s9 }
  0xc5   : > { %p340_p4 = scmp.lt.s32.totalorder %s875_s10, 0  ;;  %s167_s12 = sadd.s32 8, %s875_s10 }
  0xc7   : > { %s877_s12 = smov (!%p340_p4, %s167_s12), %s875_s10 }
  0xc8   : > { %s169_s24 = scalar_lea.sflag [#allocation3], %s877_s12 }
  0xc9   : > { %641 = dma.done.wait %s169_s24, 16 }
  0xca   : > { %642 = vsyncadd %s169_s24, 4294967280  ;;  %s822_s13 = sadd.s32 8, %s647_s5  ;;  %s315_s18 = scalar_lea.vmem [#allocation2], %s647_s5 }
  0xcb   : > { %p358_p5 = scmp.lt.s32.totalorder %s822_s13, 16  ;;  %p180_p6 = scmp.lt.s32.totalorder %s822_s13, 0 }
  0xcc   : > { %s181_s14 = ssub.s32 0, %s822_s13  ;;  %s316_s23 = scalar_lea.vmem %s315_s18, 8 [#allocation2] }
  0xcd   : > { %s355_s15 = scalar_select %p358_p5, [#allocation5], [#allocation28] }
  0xce   : > { %s356_s16 = scalar_select %p358_p5, %s822_s13, 0 }
  0xcf   : > { %s342_s20 = smin.u32 %s181_s14, %s822_s13  ;;  %s203_s26 = sshll.u32 %s316_s23, 4  ;;  %s204_s26 = int_to_ptr.vmem [resolvable:$true] %s203_s26 }
  0xd0   : > { %s179_s0 = sld [smem:[%s355_s15 + %s356_s16]]  ;;  %s183_s22 = sand.u32 7, %s342_s20  }
  0xd1   : > { %s184_s17 = ssub.s32 0, %s183_s22 }
  0xd2   : > { %s879_s17 = smov (!%p180_p6, %s184_s17), %s183_s22 }
  0xd3   : > { %p344_p7 = scmp.lt.s32.totalorder %s879_s17, 0  ;;  %s190_s27 = sadd.s32 8, %s879_s17 }
  0xd5   : > { %s881_s27 = smov (!%p344_p7, %s190_s27), %s879_s17 }
  0xd6   : > { %s345_s28 = sshll.u32 %s179_s0, 4  ;;  %s195_s4 = scalar_lea.sflag [#allocation3], %s881_s27 }
  0xd7   : > { %s193_s25 = scalar_lea.hbm %s872_s2, %s345_s28 }
  0xd8   : > { %s585_s30 = scalar_lea.hbm %s193_s25, 16  ;;  %p590_p11 = scmp.lt.u32.totalorder %s193_s25, %s872_s2 }
  0xd9   : > { %p586_p8 = scmp.ne.s32.totalorder %s193_s25, %s585_s30  ;;  %p591_p12 = scmp.lt.u32.totalorder %s704_s7, %s585_s30 }
  0xda   : > { %p593_p0 = scmp.lt.u32.totalorder %s585_s30, %s193_s25 }
  0xdb   : > { %p587_p9 = pnand %p586_p8, %p358_p5  ;;  %p592_p13 = por %p591_p12, %p590_p11 }
  0xdd   : > { %p588_p10 = pneg %p587_p9  ;;  %p594_p1 = por %p593_p0, %p592_p13 }
  0xdf   : > { %p595_p2 = pnand %p594_p1, %p588_p10 }
  0xe1   : > { %598 = shalt.err (!%p595_p2)  }
  0xe2   : > { %s599_s9 = scalar_lea.vmem %s204_s26, 16  ;;  %p606_p7 = scmp.lt.s32.totalorder %s204_s26, %s687_s19 }
  0xe3   : > { %p600_p3 = scmp.ne.s32.totalorder %s204_s26, %s599_s9  ;;  %p607_p8 = scmp.lt.s32.totalorder %s713_s11, %s599_s9 }
  0xe5   : > { %p601_p4 = pnand %p600_p3, %p358_p5  ;;  %p608_p9 = por %p607_p8, %p606_p7 }
  0xe7   : > { %p602_p6 = pneg %p601_p4 }
  0xe9   : > { %p609_p11 = pnand %p608_p9, %p602_p6 }
  0xeb   : > { %612 = shalt.err (!%p609_p11)  }
  0xec   : > { %357 = dma.hbm_to_vmem [thread:$0]  (%p358_p5), %s193_s25, 16, %s204_s26, %s195_s4 }
  0xed   : > { %s156_s5 = sadd.s32 1, %s647_s5  }
  0xee   : > { %p153_p10 = scmp.ge.s32.totalorder %s156_s5, 16  }
  0xef   :  { %v209_v0 = vld [vmem:[%s871_s1] sm:$0xff] (%p153_p10)  ;;  %v658_v1 = vmov (%p153_p10), 0   ;;  %v210_v2 = vld [vmem:[%s871_s1 + $0x8] sm:$0xff] (%p153_p10)  ;;  %s659_s13 = smov (%p153_p10), [#allocation6]  }
  0xf0   :  { %155 = sbr.rel (!%p153_p10) target bundleno = 192 (0xc0), region = 104  ;;  %380 = vset.pattern.permute.xlu0 (%p153_p10), %v658_v1  ;;  %v207_v3 = vld [vmem:[#allocation2] sm:$0xff] (%p153_p10)  ;;  %s230_s15 = sshll.u32 (%p153_p10), %s659_s13, 4  ;;  %v208_v6 = vld [vmem:[#allocation2 + $0x8] sm:$0xff] (%p153_p10)  ;;  %s231_s15 = int_to_ptr.vmem [resolvable:$true] %s230_s15 }
  0xf1   :  { %213 = vperm.xlu0 (%p153_p10), %380, %v209_v0   ;;  %s613_s2 = scalar_lea.vmem (%p153_p10), %s231_s15, 256  ;;  %p618_p12 = scmp.lt.s32.totalorder (%p153_p10), %s231_s15, %s231_s15 }
  0xf2   :  { %p614_p5 = scmp.ne.s32.totalorder (%p153_p10), %s231_s15, %s613_s2  ;;  %p619_p13 = scmp.lt.s32.totalorder (%p153_p10), %s613_s2, %s613_s2 }
  0xf4   :  { %p620_p0 = por (%p153_p10), %p619_p13, %p618_p12 }
  0xf5   :  { %218 = vperm.xlu0 (%p153_p10), %380, %v210_v2  }
  0xf6   :  { %p621_p1 = pnand (%p153_p10), %p620_p0, %p614_p5 }
 0x170   :  { %v214_v4 = vpop.permute.xlu0 %213 }
 0x171   :  { %v221_v5 = vmul.f32 %v214_v4, %v207_v3 }
 0x173   :  { %223 = vst [vmem:[#allocation6] sm:$0xff] %v221_v5 }
 0x174   :  { %v219_v7 = vpop.permute.xlu0 %218 }
 0x175   :  { %v222_v8 = vmul.f32 %v219_v7, %v208_v6 }
 0x177   :  { %224 = vst [vmem:[#allocation6 + $0x8] sm:$0xff] %v222_v8 }
 0x178   :  { %624 = shalt.err (!%p621_p1)
}
 0x179   :  { %s625_s7 = scalar_lea.hbm %s873_s3, 256 }
 0x17a   :  { %p626_p2 = scmp.ne.s32.totalorder %s873_s3, %s625_s7  ;;  %p629_p3 = scmp.lt.u32.totalorder %s625_s7, %s873_s3 }
 0x17c   :  { %p631_p4 = pnand %p629_p3, %p626_p2 }
 0x17e   :  { %634 = shalt.err (!%p631_p4)
}
 0x17f   :  { %s660_s0 = smov 128   ;;  %s661_s22 = smov 8  }
 0x180   :  { %236 = dma.vmem_to_hbm [thread:$0]  %s231_s15, 256, %s873_s3, [#allocation7], %s660_s0, %s660_s0, %s661_s22  }
 0x181   :  { %643 = dma.done.wait [#allocation7], 256  }
 0x182   :  { %644 = vsyncadd [#allocation7], 4294967040 }
 0x183   :  { %240 = vsyncpa [#allocation7], 1 }
 0x184   :  { %241 = vsyncmov [#allocation3] }
 0x187   :  { %s242_s23 = vpop.sfrf %241 }
 0x188   :  { %p346_p6 = scmp.ne.s32.totalorder %s242_s23, 0 }
 0x18a   :  { %246 = shalt.err (%p346_p6)  }
 0x18b   :  { %248 = vsyncmov [#allocation3 + $0x1] }
 0x18e   :  { %s249_s26 = vpop.sfrf %248 }
 0x18f   :  { %p347_p7 = scmp.ne.s32.totalorder %s249_s26, 0 }
 0x191   :  { %253 = shalt.err (%p347_p7)  }
 0x192   :  { %255 = vsyncmov [#allocation3 + $0x2] }
 0x195   :  { %s256_s27 = vpop.sfrf %255 }
 0x196   :  { %p348_p8 = scmp.ne.s32.totalorder %s256_s27, 0 }
 0x198   :  { %260 = shalt.err (%p348_p8)  }
 0x199   :  { %262 = vsyncmov [#allocation3 + $0x3] }
 0x19c   :  { %s263_s28 = vpop.sfrf %262 }
 0x19d   :  { %p349_p9 = scmp.ne.s32.totalorder %s263_s28, 0 }
 0x19f   :  { %267 = shalt.err (%p349_p9)  }
 0x1a0   :  { %269 = vsyncmov [#allocation3 + $0x4] }
 0x1a3   :  { %s270_s3 = vpop.sfrf %269 }
 0x1a4   :  { %p350_p11 = scmp.ne.s32.totalorder %s270_s3, 0 }
 0x1a6   :  { %274 = shalt.err (%p350_p11)  }
 0x1a7   :  { %276 = vsyncmov [#allocation3 + $0x5] }
 0x1aa   :  { %s277_s29 = vpop.sfrf %276 }
 0x1ab   :  { %p351_p10 = scmp.ne.s32.totalorder %s277_s29, 0 }
 0x1ad   :  { %281 = shalt.err (%p351_p10)  }
 0x1ae   :  { %283 = vsyncmov [#allocation3 + $0x6] }
 0x1b1   :  { %s284_s21 = vpop.sfrf %283 }
 0x1b2   :  { %p352_p5 = scmp.ne.s32.totalorder %s284_s21, 0 }
 0x1b4   :  { %288 = shalt.err (%p352_p5)  }
 0x1b5   :  { %290 = vsyncmov [#allocation3 + $0x7] }
 0x1b8   :  { %s291_s25 = vpop.sfrf %290 }
 0x1b9   :  { %p353_p12 = scmp.ne.s32.totalorder %s291_s25, 0 }
 0x1bb   :  { %295 = shalt.err (%p353_p12)  }

</bundles_post_ra>
